<compile_context>
chip_gen: v7x
topology: tpu7x:2x2x1
jax: 0.10.0
libtpu: 0.0.40
codegen_flags: <defaults>
</compile_context>

<pallas_src>
import functools

import numpy as np

import jax
import jax.numpy as jnp
from jax.experimental import pallas as pl
from jax.experimental.pallas import tpu as pltpu


def make_pe_table(d_model: int, max_seq_len: int, dtype=jnp.float32):
    """Reproduces the PyTorch __init__ double loop exactly (vectorized).

    pe[pos, i]   = sin(pos / 10000 ** (2 * i       / d_model))   for even i
    pe[pos, i+1] = cos(pos / 10000 ** (2 * (i + 1) / d_model))
    """
    assert d_model % 2 == 0, "d_model must be even (PyTorch loop writes pe[:, i+1])"
    pos = np.arange(max_seq_len, dtype=np.float64)[:, None]
    i_even = np.arange(0, d_model, 2, dtype=np.float64)[None, :]
    pe = np.zeros((max_seq_len, d_model), dtype=np.float64)
    pe[:, 0::2] = np.sin(pos / 10000.0 ** (2.0 * i_even / d_model))
    pe[:, 1::2] = np.cos(pos / 10000.0 ** (2.0 * (i_even + 1.0) / d_model))
    # Build the table in the model dtype once, so no per-call cast is needed.
    return jnp.asarray(pe, dtype=dtype)[None, :, :]  # (1, max_seq_len, d_model)


def _concat_pe_kernel(x_ref, pe_ref, o_ref, *, d_x: int, split_store: bool):
    # x_ref : (1, tS, Dx)   VMEM tile
    # pe_ref: (1, tS, Dm)   VMEM tile (same rows for every batch step)
    # o_ref : (1, tS, Dx + Dm)
    pe = pe_ref[...].astype(o_ref.dtype)
    if split_store:
        # Dx % 128 == 0: both stores start at lane-aligned offsets -> unmasked vst.
        o_ref[:, :, :d_x] = x_ref[...]
        o_ref[:, :, d_x:] = pe
    else:
        # Unaligned seam: build the tile in registers, issue one lane-dense store
        # instead of a masked/rotated store at lane offset d_x.
        o_ref[...] = jnp.concatenate([x_ref[...], pe], axis=-1)


def _pick_seq_tile(S: int, Dx: int, Dm: int, itemsize: int) -> int:
    """Seq tile targeting ~12 MiB of (in+out) traffic per step, rounded to the
    dtype sublane multiple.  The grid uses cdiv, so tS need not divide S."""
    sublane = max(8, 32 // max(itemsize, 1))          # 8 f32 / 16 bf16 / 32 int8
    bytes_per_row = 2 * (Dx + Dm) * itemsize          # (x + pe) read + out written
    rows = (12 * 1024 * 1024) // max(bytes_per_row, 1)
    rows = max(sublane, min(1024, (rows // sublane) * sublane))
    return S if S <= rows else rows


def _vmem_limit_bytes(step_bytes: int) -> int:
    """Explicit scoped-VMEM request: enough for the double-buffered streams,
    but capped well below physical capacity (v7x has only 64 MiB per core)."""
    cap = 64 * 1024 * 1024
    try:
        info = pltpu.get_tpu_info()
        cap = int(getattr(info, "vmem_capacity_bytes", cap))
    except Exception:
        pass
    budget = (cap * 3) // 4
    return int(min(budget, max(16 * 1024 * 1024, 3 * step_bytes)))


def concatenated_positional_encoder(x: jax.Array, pe: jax.Array) -> jax.Array:
    """x: (B, S, Dx); pe: (1, max_seq_len, Dm). Returns (B, S, Dx + Dm)."""
    B, S, Dx = x.shape
    max_seq_len, Dm = pe.shape[1], pe.shape[-1]
    if S > max_seq_len:
        raise ValueError(f"seq_len {S} exceeds max_seq_len {max_seq_len}")

    Do = Dx + Dm
    itemsize = jnp.dtype(x.dtype).itemsize
    tS = _pick_seq_tile(S, Dx, Dm, itemsize)
    n_s = pl.cdiv(S, tS)

    step_bytes = tS * (Dx + Dm + Do) * itemsize
    vmem_limit = _vmem_limit_bytes(step_bytes)

    split_store = (Dx % 128 == 0)
    kernel = functools.partial(_concat_pe_kernel, d_x=Dx, split_store=split_store)

    return pl.pallas_call(
        kernel,
        out_shape=jax.ShapeDtypeStruct((B, S, Do), x.dtype),
        grid_spec=pltpu.PrefetchScalarGridSpec(
            num_scalar_prefetch=0,
            # Batch innermost: the pe block index (0, s, 0) is unchanged across
            # consecutive steps, so its DMA is skipped for b > 0.
            grid=(n_s, B),
            in_specs=[
                pl.BlockSpec((1, tS, Dx), lambda s, b: (b, s, 0)),
                pl.BlockSpec((1, tS, Dm), lambda s, b: (0, s, 0)),
            ],
            out_specs=pl.BlockSpec((1, tS, Do), lambda s, b: (b, s, 0)),
        ),
        compiler_params=pltpu.CompilerParams(
            dimension_semantics=("parallel", "parallel"),
            vmem_limit_bytes=vmem_limit,
        ),
    )(x, pe)


if __name__ == "__main__":
    def _check(batch, seq, d_model, max_seq_len, key):
        x = jax.random.normal(key, (batch, seq, d_model), dtype=jnp.float32)
        pe = make_pe_table(d_model, max_seq_len, dtype=jnp.float32)
        out = jax.block_until_ready(concatenated_positional_encoder(x, pe))
        # Reference in plain JAX (same semantics as the PyTorch forward).
        pe_rep = jnp.broadcast_to(pe[:, :seq, :], (batch, seq, d_model))
        ref = jnp.concatenate([x, pe_rep], axis=-1)
        assert out.shape == (batch, seq, 2 * d_model), out.shape
        np.testing.assert_allclose(np.asarray(out), np.asarray(ref), rtol=0, atol=0)

    key = jax.random.PRNGKey(0)
    k1, k2 = jax.random.split(key)
    # Unaligned-seam path (Dx=32 -> single concatenated lane-dense store).
    _check(batch=2, seq=8, d_model=32, max_seq_len=16, key=k1)
    # Lane-aligned path (Dx=128 -> two unmasked slab stores).
    _check(batch=2, seq=16, d_model=128, max_seq_len=32, key=k2)

    print("KERNEL_OK")
</pallas_src>

<mosaic_0001>
module attributes {stable_mosaic.version = 11 : i64} {
  func.func @_concat_pe_kernel(%arg0: i32, %arg1: i32, %arg2: memref<1x8x32xf32, #tpu.memory_space<vmem>>, %arg3: memref<1x8x32xf32, #tpu.memory_space<vmem>>, %arg4: memref<1x8x64xf32, #tpu.memory_space<vmem>>) attributes {dimension_semantics = [#tpu.dimension_semantics<parallel>, #tpu.dimension_semantics<parallel>], iteration_bounds = array<i64: 1, 2>, scalar_prefetch = 0 : i64, scratch_operands = 0 : i64, tpu.core_type = #tpu.core_type<tc>, window_params = [{transform_indices = @transform_0, window_bounds = array<i64: 1, 8, 32>}, {transform_indices = @transform_1, window_bounds = array<i64: 1, 8, 32>}, {transform_indices = @transform_2, window_bounds = array<i64: 1, 8, 64>}]} {
    %c0 = arith.constant 0 : index
    %c0_0 = arith.constant 0 : index
    %c0_1 = arith.constant 0 : index
    %0 = vector.load %arg3[%c0, %c0_0, %c0_1] : memref<1x8x32xf32, #tpu.memory_space<vmem>>, vector<1x8x32xf32>
    %c0_2 = arith.constant 0 : index
    %c0_3 = arith.constant 0 : index
    %c0_4 = arith.constant 0 : index
    %1 = vector.load %arg2[%c0_2, %c0_3, %c0_4] : memref<1x8x32xf32, #tpu.memory_space<vmem>>, vector<1x8x32xf32>
    %2 = tpu.concatenate %1, %0 in 2 : vector<1x8x32xf32>, vector<1x8x32xf32> -> vector<1x8x64xf32>
    %c0_5 = arith.constant 0 : index
    %c0_6 = arith.constant 0 : index
    %c0_7 = arith.constant 0 : index
    %3 = vector.load %arg4[%c0_5, %c0_6, %c0_7] : memref<1x8x64xf32, #tpu.memory_space<vmem>>, vector<1x8x64xf32>
    tpu.vector_store %arg4[%c0_5, %c0_6, %c0_7], %2 {strides = array<i32>} : memref<1x8x64xf32, #tpu.memory_space<vmem>>, vector<1x8x64xf32>,
    return
  }
  func.func @transform_0(%arg0: i32, %arg1: i32) -> (i32, i32, i32) {
    %c0_i32 = arith.constant 0 : i32
    %c0_i32_0 = arith.constant 0 : i32
    return %arg1, %arg0, %c0_i32 : i32, i32, i32
  }
  func.func @transform_1(%arg0: i32, %arg1: i32) -> (i32, i32, i32) {
    %c0_i32 = arith.constant 0 : i32
    %c0_i32_0 = arith.constant 0 : i32
    %c0_i32_1 = arith.constant 0 : i32
    return %c0_i32, %arg0, %c0_i32_0 : i32, i32, i32
  }
  func.func @transform_2(%arg0: i32, %arg1: i32) -> (i32, i32, i32) {
    %c0_i32 = arith.constant 0 : i32
    %c0_i32_0 = arith.constant 0 : i32
    return %arg1, %arg0, %c0_i32 : i32, i32, i32
  }
}

</mosaic_0001>

<bundles_post_ra>
// kernel: tpu_custom_call.1
= control target key start
LH: loop header
LB: loop body
LE: loop exit
PB: predicated region body
PF: predicated region fallthrough
CT: control target
= control target key end

     0   :  { %7 = vsyncpa [#allocation3], 0  ;;  %s786_s0 = inlined_call_operand.hbm [shape: f32[2,8,32], index: 0, kind: input, shape index: {}]   ;;  %s787_s1 = inlined_call_operand.hbm [shape: f32[1,16,32], index: 1, kind: input, shape index: {}]   ;;  %s788_s2 = inlined_call_operand.hbm [shape: f32[2,8,64], index: 2, kind: output, shape index: {}]  }
   0x1   :  { %9 = vsyncpa [#allocation3 + $0x1], 0 }
   0x2   :  { %10 = vsyncpa [#allocation6], 0 }
   0x3   :  { %11 = vsyncpa [#allocation4], 0 }
   0x4   :  { %13 = vsyncpa [#allocation4 + $0x1], 0  ;;  %s567_s9 = smov 0   ;;  %s569_s10 = smov 0  }
   0x5   :  { %s571_s11 = smov 0   ;;  %s573_s12 = smov 0  }
   0x6   :  { %s575_s13 = smov 0   ;;  %s577_s14 = smov 0  }
   0x7 LB: > { %s313_s15 = sadd.s32 4294967295, %s546_s14   ;;  %s314_s16 = sadd.s32 4294967294, %s546_s14   ;;  %s546_s14 = sphi %s577_s14, %s19_s14   ;;  %s542_s13 = sphi %s575_s13, %s813_s13   ;;  %s538_s12 = sphi %s573_s12, %s812_s12   ;;  %s534_s11 = sphi %s571_s11, %s811_s11   ;;  %s530_s10 = sphi %s569_s10, %s810_s10   ;;  %s526_s9 = sphi %s567_s9, %s809_s9  }
   0x8   : > { %p53_p0 = scmp.ne.s32.totalorder %s530_s10, %s526_s9  ;;  %p601_p1 = scmp.eq.s32.totalorder %s313_s15, 0 }
   0x9   : > { %p605_p2 = scmp.eq.s32.totalorder %s313_s15, 1  ;;  %p111_p3 = scmp.eq.s32.totalorder %s314_s16, 1 }
   0xa   : > { %s793_s17 = scalar_select %p601_p1, 1, 0 }
   0xb   : > { %s794_s18 = scalar_select %p605_p2, 1, 0 }
   0xc   : > { %p611_p4 = por %p601_p1, %p53_p0  ;;  %p315_p5 = scmp.ge.s32.totalorder %s546_s14, 1 }
   0xd   : > { %p616_p6 = por %p111_p3, %p53_p0  ;;  %p118_p7 = scmp.lt.s32.totalorder %s546_s14, 3 }
   0xe   : > { %s795_s19 = scalar_select %p611_p4, 1, 0 }
   0xf   : > { %s796_s20 = scalar_select %p616_p6, 1, 0 }
  0x10   : > { %p621_p8 = pnand %p315_p5, %p118_p7  ;;  %s548_s22 = smov [#allocation5]  }
  0x11   : > { %s133_s23 = sshll.u32 %s548_s22, 4  ;;  %s28_s25 = sadd.s32 1, %s542_s13  ;;  %s134_s23 = int_to_ptr.vmem [resolvable:$true] %s133_s23 }
  0x12   : > { %s797_s21 = scalar_select %p621_p8, 1, 0 }
  0x13   : > { %p336_p10 = pneg %p621_p8  ;;  %s40_s26 = sadd.s32 1, %s534_s11 }
  0x14   : > { %p636_p12 = scmp.ge.s32.totalorder %s28_s25, 2  ;;  %s402_s30 = scalar_lea.hbm %s787_s1, 128 }
  0x15   : > { %p630_p11 = pnand %p336_p10, %p601_p1  ;;  %p403_p13 = scmp.ne.s32.totalorder %s787_s1, %s402_s30 }
  0x16   : > { %s799_s27 = scalar_select %p636_p12, 1, 0 }
  0x17   : > { %p404_p0 = pneg %p630_p11  ;;  %s407_s7 = scalar_lea.hbm %s787_s1, 256 }
  0x18   : > { %p408_p7 = scmp.lt.u32.totalorder %s407_s7, %s402_s30  ;;  %p409_p10 = scmp.lt.u32.totalorder %s402_s30, %s787_s1 }
  0x19   : > { %p405_p3 = pnand %p404_p0, %p403_p13 }
  0x1a   : > { %p410_p9 = por %p409_p10, %p408_p7 }
  0x1b   : > { %p406_p5 = pneg %p405_p3 }
  0x1d   : > { %p411_p6 = pnand %p410_p9, %p406_p5 }
  0x1f   : > { %414 = shalt.err (!%p411_p6)
}
  0x20   : > { %s415_s16 = scalar_lea.vmem %s134_s23, 128  ;;  %p423_p2 = scmp.lt.s32.totalorder %s134_s23, %s134_s23 }
  0x21   : > { %p416_p1 = scmp.ne.s32.totalorder %s134_s23, %s415_s16  ;;  %p424_p12 = scmp.lt.s32.totalorder %s415_s16, %s415_s16 }
  0x23   : > { %p418_p4 = pnand %p416_p1, %p404_p0  ;;  %p425_p13 = por %p424_p12, %p423_p2 }
  0x25   : > { %p419_p8 = pneg %p418_p4 }
  0x27   : > { %p426_p3 = pnand %p425_p13, %p419_p8 }
  0x29   : > { %429 = shalt.err (!%p426_p3)
}
  0x2a   : > { %339 = dma.hbm_to_vmem [thread:$0]  (!%p630_p11), %s787_s1, 128, %s134_s23, [#allocation6]  }
  0x2b   : > { %p800_p1 = scmp.ne.s32.totalorder %s799_s27, 0  ;;  %p47_p2 = scmp.ne.s32.totalorder %s534_s11, %s530_s10 }
  0x2c   : > { %p48_p4 = scmp.eq.s32.totalorder %s546_s14, 0  ;;  %p349_p6 = scmp.lt.s32.totalorder %s546_s14, 2 }
  0x2d   : > { %s815_s25 = smov (%p800_p1, %s28_s25), 0  ;;  %p801_p12 = scmp.ne.s32.totalorder %s794_s18, 0 }
  0x2e   : > { %s35_s24 = ssub.s32 %s542_s13, %s815_s25  ;;  %p49_p9 = por %p48_p4, %p47_p2 }
  0x2f   : > { %p38_p8 = scmp.eq.s32.totalorder %s35_s24, 0  ;;  %p671_p0 = por %p801_p12, %p47_p2 }
  0x30   : > { %s144_s30 = sand.u32 1, %s534_s11   ;;  %s319_s27 = sshll.u32 %s542_s13, 7 }
  0x31   : > { %s679_s3 = scalar_select %p38_p8, %s534_s11, %s40_s26  }
  0x32   : > { %s318_s23 = sshll.u32 %s144_s30, 3  ;;  %s685_s6 = scalar_lea.hbm %s786_s0, %s319_s27 }
  0x33   : > { %s148_s18 = scalar_lea.vmem [#allocation2], %s318_s23  ;;  %p689_p11 = pnand %p349_p6, %p49_p9 }
  0x34   : > { %s156_s7 = sshll.u32 %s148_s18, 4  ;;  %s145_s26 = scalar_lea.sflag [#allocation3], %s144_s30  ;;  %s687_s7 = int_to_ptr.vmem [resolvable:$true] %s156_s7 }
  0x35   : > { %s430_s15 = scalar_lea.hbm %s685_s6, 128  ;;  %p432_p7 = pneg %p689_p11 }
  0x36   : > { %p431_p5 = scmp.ne.s32.totalorder %s685_s6, %s430_s15  ;;  %s435_s28 = scalar_lea.hbm %s786_s0, 256 }
  0x37   : > { %p436_p3 = scmp.lt.u32.totalorder %s685_s6, %s786_s0  ;;  %p437_p1 = scmp.lt.u32.totalorder %s435_s28, %s430_s15 }
  0x38   : > { %p433_p10 = pnand %p432_p7, %p431_p5  ;;  %p439_p4 = scmp.lt.u32.totalorder %s430_s15, %s685_s6 }
  0x39   : > { %p438_p2 = por %p437_p1, %p436_p3 }
  0x3a   : > { %p434_p13 = pneg %p433_p10 }
  0x3b   : > { %p440_p6 = por %p439_p4, %p438_p2 }
  0x3d   : > { %p441_p8 = pnand %p440_p6, %p434_p13 }
  0x3f   : > { %444 = shalt.err (!%p441_p8)
}
  0x40   : > { %s445_s30 = scalar_lea.vmem %s687_s7, 128  ;;  %s549_s27 = smov [#allocation2]  }
  0x41   : > { %p446_p9 = scmp.ne.s32.totalorder %s687_s7, %s445_s30  ;;  %s450_s4 = sshll.u32 %s549_s27, 4  ;;  %s451_s4 = int_to_ptr.vmem [resolvable:$false] %s450_s4 }
  0x42   : > { %s452_s5 = scalar_lea.vmem %s451_s4, 256  ;;  %p453_p10 = scmp.lt.s32.totalorder %s687_s7, %s451_s4 }
  0x43   : > { %p448_p12 = pnand %p446_p9, %p432_p7  ;;  %p454_p3 = scmp.lt.s32.totalorder %s452_s5, %s445_s30 }
  0x45   : > { %p449_p5 = pneg %p448_p12  ;;  %p455_p1 = por %p454_p3, %p453_p10 }
  0x47   : > { %p456_p2 = pnand %p455_p1, %p449_p5 }
  0x49   : > { %459 = shalt.err (!%p456_p2)
}
  0x4a   : > { %343 = dma.hbm_to_vmem [thread:$0]  (!%p689_p11), %s685_s6, 128, %s687_s7, %s145_s26  }
  0x4b   : > { %p804_p13 = scmp.ne.s32.totalorder %s797_s21, 0 }
  0x4c   : > { %s721_s18 = sand.u32 (!%p804_p13), 1, %s530_s10   ;;  %p805_p7 = scmp.ne.s32.totalorder (!%p804_p13), %s795_s19, 0 }
  0x4d   : > { %165 = sbr.rel (%p804_p13) target bundleno = 219 (0xdb), region = 28  ;;  %s321_s15 = sshll.u32 (!%p804_p13), %s721_s18, 3 }
  0x4e   : > { %s168_s16 = scalar_lea.sflag (!%p804_p13), [#allocation3], %s721_s18  ;;  %s171_s22 = scalar_lea.vmem (!%p804_p13), [#allocation2], %s321_s15 }
  0x54   : > { %513 = dma.done.wait (%p805_p7), %s168_s16, 128  }
  0x55   : > { %515 = vsyncadd (%p805_p7), %s168_s16, 4294967168  ;;  %p806_p4 = scmp.ne.s32.totalorder %s793_s17, 0 }
  0x57   : > { %517 = dma.done.wait (%p806_p4), [#allocation6], 128  }
  0x58   : > { %519 = vsyncadd (%p806_p4), [#allocation6], 4294967168  ;;  %v196_v0 = vld [vmem:[#allocation5] sm:$0xff]  ;;  %s550_s21 = smov 32   ;;  %s325_s6 = sshll.u32 %s538_s12, 7  ;;  %v197_v1 = vld [vmem:[%s171_s22] sm:$0xff] }
  0x59   : > { %199 = vrot.lane.b32.xlu0 %v196_v0, %s550_s21  ;;  %s195_s7 = scalar_lea.vmem [#allocation7], %s321_s15  ;;  %vm202_vm0 = vcmask 261120   ;;  %vm204_vm1 = vcmask 523264   ;;  %s737_s28 = scalar_lea.hbm %s788_s2, %s325_s6 }
  0x5a   : > { %s221_s8 = sshll.u32 %s195_s7, 4  ;;  %s207_s17 = scalar_lea.sflag [#allocation4], %s721_s18  ;;  %s739_s8 = int_to_ptr.vmem [resolvable:$true] %s221_s8 }
  0x5b   : > { %s460_s12 = scalar_lea.vmem %s739_s8, 128  ;;  %s551_s24 = smov [#allocation7]  }
  0x5c   : > { %p461_p11 = scmp.ne.s32.totalorder %s739_s8, %s460_s12  ;;  %s464_s23 = sshll.u32 %s551_s24, 4  ;;  %s465_s23 = int_to_ptr.vmem [resolvable:$false] %s464_s23 }
  0x5d   : > { %s466_s30 = scalar_lea.vmem %s465_s23, 256  ;;  %p467_p9 = scmp.lt.s32.totalorder %s739_s8, %s465_s23 }
  0x5e   : > { %p462_p6 = pnand %p461_p11, %p671_p0  ;;  %p468_p12 = scmp.lt.s32.totalorder %s466_s30, %s460_s12 }
  0x60   : > { %p463_p8 = pneg %p462_p6  ;;  %p469_p5 = por %p468_p12, %p467_p9 }
  0x62   : > { %p470_p10 = pnand %p469_p5, %p463_p8 }
  0xcb   : > { %v200_v2 = vpop.permute.xlu0 %199 }
  0xcc   : > { %v203_v3 = vsel %vm202_vm0, %v197_v1, %v200_v2 }
  0xcd   : > { %205 = vst.msk [vmem:[%s195_s7] sm:$0xff] %vm204_vm1, %v203_v3 }
  0xce   : > { %473 = shalt.err (!%p470_p10)
}
  0xcf   : > { %s474_s27 = scalar_lea.hbm %s737_s28, 128  ;;  %s478_s18 = scalar_lea.hbm %s788_s2, 256 }
  0xd0   : > { %p475_p3 = scmp.ne.s32.totalorder %s737_s28, %s474_s27  ;;  %p479_p13 = scmp.lt.u32.totalorder %s737_s28, %s788_s2 }
  0xd1   : > { %p480_p7 = scmp.lt.u32.totalorder %s478_s18, %s474_s27  ;;  %p482_p11 = scmp.lt.u32.totalorder %s474_s27, %s737_s28 }
  0xd2   : > { %p476_p1 = pnand %p475_p3, %p671_p0 }
  0xd3   : > { %p481_p4 = por %p480_p7, %p479_p13 }
  0xd4   : > { %p477_p2 = pneg %p476_p1 }
  0xd5   : > { %p483_p6 = por %p482_p11, %p481_p4 }
  0xd7   : > { %p484_p8 = pnand %p483_p6, %p477_p2 }
  0xd9   : > { %487 = shalt.err (!%p484_p8)
}
  0xda   : > { %334 = dma.vmem_to_hbm [thread:$0]  (%p671_p0), %s739_s8, 128, %s737_s28, %s207_s17  }
  0xdb PF: > { %s233_s22 = sand.u32 1, %s526_s9   ;;  %p807_p9 = scmp.ne.s32.totalorder %s796_s20, 0 }
  0xdc   : > { %p808_p12 = scmp.ge.s32.totalorder %s546_s14, 2  ;;  %s234_s21 = scalar_lea.sflag [#allocation4], %s233_s22 }
  0xde   : > { %p345_p5 = pnand %p808_p12, %p807_p9 }
  0xe0   : > { %521 = dma.done.wait (!%p345_p5), %s234_s21, 128  }
  0xe1   : > { %523 = vsyncadd (!%p345_p5), %s234_s21, 4294967168  ;;  %s19_s14 = sadd.s32 1, %s546_s14   ;;  %s809_s9 = smov %s530_s10 }
  0xe2   : > { %p16_p10 = scmp.ge.s32.totalorder %s19_s14, 4   ;;  %s810_s10 = smov %s534_s11 }
  0xe3   : > { %s811_s11 = smov %s679_s3  ;;  %s812_s12 = smov %s542_s13 }
  0xe4   : > { %s813_s13 = smov %s815_s25  ;;  %18 = sbr.rel (!%p16_p10) target bundleno = 7 (0x7), region = 78 }
  0xeb   :  { %239 = vsyncpa [#allocation3], 1 }
  0xec   :  { %241 = vsyncpa [#allocation3 + $0x1], 1 }
  0xed   :  { %242 = vsyncpa [#allocation6], 1 }
  0xee   :  { %243 = vsyncpa [#allocation4], 1 }
  0xef   :  { %245 = vsyncpa [#allocation4 + $0x1], 1 }

</bundles_post_ra>
